<compile_context>
chip_gen: v6e
topology: v6e:2x2x1
jax: 0.10.0
libtpu: 0.0.40
codegen_flags: <defaults>
</compile_context>

<pallas_src>
import functools

import jax
import jax.numpy as jnp
from jax.experimental import pallas as pl
from jax.experimental.pallas import tpu as pltpu

BN_EPS = 1e-5
LANE = 128


def _round_up(n, m):
    return ((n + m - 1) // m) * m


def _fused_mlp_kernel(*refs, n_layers, eps):
    """Whole MLP in one kernel invocation; the layer loop is unrolled at trace time.

    refs layout:
      refs[0]                         : (B, Fin0_p)      bf16  padded input
      refs[1 .. n_layers]             : (Fin_p, Fout_p)  bf16  per-layer padded weight
      refs[1+n_layers .. 2*n_layers]  : (3, Fout_p)      f32   per-layer [bias; gamma; beta]
      refs[1+2*n_layers]              : (B, FoutL_p)     f32   padded output
    """
    x_ref = refs[0]
    w_refs = refs[1:1 + n_layers]
    p_refs = refs[1 + n_layers:1 + 2 * n_layers]
    o_ref = refs[1 + 2 * n_layers]

    act = x_ref[...]                                         # (B, Fin_p) bf16
    for l in range(n_layers):
        # Linear on the MXU: bf16 operands, f32 accumulation.
        y = jnp.dot(act, w_refs[l][...],
                    preferred_element_type=jnp.float32)      # (B, Fout_p) f32
        p = p_refs[l][...]                                   # (3, Fout_p) f32
        y = y + p[0:1, :]                                    # + bias (cancelled by the BN
                                                             #   mean; kept for exact
                                                             #   Linear semantics — cheap)

        # BatchNorm1d, training mode: batch mean, biased batch variance, affine.
        # Padded feature columns have y = mean = var = gamma = beta = 0 and stay 0.
        mean = jnp.mean(y, axis=0, keepdims=True)            # (1, Fout_p)
        centered = y - mean
        var = jnp.mean(centered * centered, axis=0, keepdims=True)
        out = centered * jax.lax.rsqrt(var + eps) * p[1:2, :] + p[2:3, :]

        if l < n_layers - 1:
            act = jnp.maximum(out, 0.0).astype(jnp.bfloat16)  # ReLU, bf16 carry
        else:
            o_ref[...] = out                                  # last layer: no ReLU


def mlp_forward(x, params, *, eps=BN_EPS):
    """Fused forward pass. x: (B, F_in) f32; params: list of (w, b, gamma, beta)."""
    n_layers = len(params)
    B, f_in = x.shape
    f_out_real = params[-1][0].shape[1]

    # Per-layer lane-dense padding: each weight padded to its own 128-multiples.
    pads = [(_round_up(w.shape[0], LANE), _round_up(w.shape[1], LANE))
            for (w, _, _, _) in params]

    w_pad, p_pad = [], []
    for i, (w, b, gamma, beta) in enumerate(params):
        fin, fout = w.shape
        fin_p, fout_p = pads[i]
        w_pad.append(jnp.zeros((fin_p, fout_p), jnp.bfloat16)
                     .at[:fin, :fout].set(w.astype(jnp.bfloat16)))
        pp = jnp.zeros((3, fout_p), jnp.float32)
        pp = pp.at[0, :fout].set(b.astype(jnp.float32))       # bias
        pp = pp.at[1, :fout].set(gamma.astype(jnp.float32))   # BN gamma
        pp = pp.at[2, :fout].set(beta.astype(jnp.float32))    # BN beta
        p_pad.append(pp)

    fin0_p = pads[0][0]
    fout_last_p = pads[-1][1]
    x_pad = (jnp.zeros((B, fin0_p), jnp.bfloat16)
             .at[:, :f_in].set(x.astype(jnp.bfloat16)))

    # Fully-fused single-invocation path: everything must be VMEM-resident at once.
    vmem_bytes = (x_pad.size * 2 + sum(w.size * 2 for w in w_pad)
                  + sum(p.size * 4 for p in p_pad) + B * fout_last_p * 4)
    assert vmem_bytes < 24 * (1 << 20), (
        "network too large for the single-invocation fused path; "
        "use a layer grid with intra-layer K/F_out tiling instead")

    in_specs = [pl.BlockSpec((B, fin0_p), lambda i: (0, 0))]
    for (fin_p, fout_p) in pads:
        in_specs.append(pl.BlockSpec((fin_p, fout_p), lambda i: (0, 0)))
    for (_, fout_p) in pads:
        in_specs.append(pl.BlockSpec((3, fout_p), lambda i: (0, 0)))

    kernel = functools.partial(_fused_mlp_kernel, n_layers=n_layers, eps=eps)
    out_pad = pl.pallas_call(
        kernel,
        out_shape=jax.ShapeDtypeStruct((B, fout_last_p), jnp.float32),
        grid_spec=pltpu.PrefetchScalarGridSpec(
            num_scalar_prefetch=0,
            grid=(1,),                      # single step: whole network fused in-kernel
            in_specs=in_specs,
            out_specs=pl.BlockSpec((B, fout_last_p), lambda i: (0, 0)),
        ),
        compiler_params=pltpu.CompilerParams(
            dimension_semantics=("arbitrary",),
        ),
    )(x_pad, *w_pad, *p_pad)

    return out_pad[:, :f_out_real]


def init_mlp_params(key, sizes):
    """Torch-like init: W, b ~ U(-1/sqrt(fan_in), 1/sqrt(fan_in)); BN gamma=1, beta=0."""
    params = []
    for s in range(len(sizes) - 1):
        fan_in, fan_out = sizes[s], sizes[s + 1]
        key, kw, kb = jax.random.split(key, 3)
        bound = 1.0 / jnp.sqrt(jnp.float32(fan_in))
        w = jax.random.uniform(kw, (fan_in, fan_out), jnp.float32, -bound, bound)
        b = jax.random.uniform(kb, (fan_out,), jnp.float32, -bound, bound)
        gamma = jnp.ones((fan_out,), jnp.float32)
        beta = jnp.zeros((fan_out,), jnp.float32)
        params.append((w, b, gamma, beta))
    return params


def mlp_reference(x, params, *, eps=BN_EPS):
    """Pure-JAX f32 reference matching the PyTorch forward (training-mode BN)."""
    n_layers = len(params)
    for i, (w, b, gamma, beta) in enumerate(params):
        y = x @ w + b
        mean = jnp.mean(y, axis=0, keepdims=True)
        var = jnp.mean((y - mean) ** 2, axis=0, keepdims=True)
        y = (y - mean) * jax.lax.rsqrt(var + eps) * gamma + beta
        if i < n_layers - 1:
            y = jnp.maximum(y, 0.0)
        x = y
    return x


if __name__ == "__main__":
    sizes = [16, 32, 32, 8]   # 3 x (Linear + BN); ReLU after the first two layers only
    batch = 8

    key = jax.random.PRNGKey(0)
    key, kx = jax.random.split(key)
    x = jax.random.normal(kx, (batch, sizes[0]), jnp.float32)

    params = init_mlp_params(key, sizes)

    out = jax.block_until_ready(mlp_forward(x, params))
    assert out.shape == (batch, sizes[-1])

    # Loose sanity check vs the f32 reference (kernel uses bf16 MXU operands, so a
    # few-percent absolute error on the BN-normalized outputs is expected by design).
    ref = mlp_reference(x, params)
    max_err = float(jnp.max(jnp.abs(out - ref)))
    assert max_err < 0.5, f"max abs error {max_err}"

    print("KERNEL_OK")
</pallas_src>

<mosaic_0001>
module attributes {stable_mosaic.version = 11 : i64} {
  func.func @_fused_mlp_kernel(%arg0: i32, %arg1: memref<8x128xbf16, #tpu.memory_space<vmem>>, %arg2: memref<128x128xbf16, #tpu.memory_space<vmem>>, %arg3: memref<128x128xbf16, #tpu.memory_space<vmem>>, %arg4: memref<128x128xbf16, #tpu.memory_space<vmem>>, %arg5: memref<3x128xf32, #tpu.memory_space<vmem>>, %arg6: memref<3x128xf32, #tpu.memory_space<vmem>>, %arg7: memref<3x128xf32, #tpu.memory_space<vmem>>, %arg8: memref<8x128xf32, #tpu.memory_space<vmem>>) attributes {dimension_semantics = [#tpu.dimension_semantics<arbitrary>], iteration_bounds = array<i64: 1>, scalar_prefetch = 0 : i64, scratch_operands = 0 : i64, tpu.core_type = #tpu.core_type<tc>, window_params = [{pipeline_mode = #tpu.pipeline_mode<synchronous>, transform_indices = @transform_0, window_bounds = array<i64: 8, 128>}, {pipeline_mode = #tpu.pipeline_mode<synchronous>, transform_indices = @transform_1, window_bounds = array<i64: 128, 128>}, {pipeline_mode = #tpu.pipeline_mode<synchronous>, transform_indices = @transform_2, window_bounds = array<i64: 128, 128>}, {pipeline_mode = #tpu.pipeline_mode<synchronous>, transform_indices = @transform_3, window_bounds = array<i64: 128, 128>}, {pipeline_mode = #tpu.pipeline_mode<synchronous>, transform_indices = @transform_4, window_bounds = array<i64: 3, 128>}, {pipeline_mode = #tpu.pipeline_mode<synchronous>, transform_indices = @transform_5, window_bounds = array<i64: 3, 128>}, {pipeline_mode = #tpu.pipeline_mode<synchronous>, transform_indices = @transform_6, window_bounds = array<i64: 3, 128>}, {pipeline_mode = #tpu.pipeline_mode<synchronous>, transform_indices = @transform_7, window_bounds = array<i64: 8, 128>}]} {
    %c0 = arith.constant 0 : index
    %c0_0 = arith.constant 0 : index
    %0 = vector.load %arg1[%c0, %c0_0] : memref<8x128xbf16, #tpu.memory_space<vmem>>, vector<8x128xbf16>
    %c0_1 = arith.constant 0 : index
    %c0_2 = arith.constant 0 : index
    %1 = vector.load %arg2[%c0_1, %c0_2] : memref<128x128xbf16, #tpu.memory_space<vmem>>, vector<128x128xbf16>
    %cst = arith.constant dense<0.000000e+00> : vector<8x128xf32>
    %2 = tpu.matmul %0, %1, %cst {dimension_numbers = #tpu.dot_dimension_numbers<[1], [0], [0], [1], [0, 0, 1, 1], [], []>} : vector<8x128xbf16>, vector<128x128xbf16>, vector<8x128xf32> -> vector<8x128xf32>
    %c0_3 = arith.constant 0 : index
    %c0_4 = arith.constant 0 : index
    %3 = vector.load %arg5[%c0_3, %c0_4] : memref<3x128xf32, #tpu.memory_space<vmem>>, vector<3x128xf32>
    %4 = vector.extract_strided_slice %3 {offsets = [0, 0], sizes = [1, 128], strides = [1, 1]} : vector<3x128xf32> to vector<1x128xf32>
    %5 = vector.broadcast %4 : vector<1x128xf32> to vector<8x128xf32>
    %6 = arith.addf %2, %5 : vector<8x128xf32>
    %cst_5 = arith.constant dense<0.000000e+00> : vector<128xf32>
    %7 = vector.multi_reduction <add>, %6, %cst_5 [0] : vector<8x128xf32> to vector<128xf32>
    %8 = vector.shape_cast %7 : vector<128xf32> to vector<1x128xf32>
    %cst_6 = arith.constant 8.000000e+00 : f32
    %9 = vector.broadcast %cst_6 : f32 to vector<1x128xf32>
    %10 = arith.divf %8, %9 : vector<1x128xf32>
    %11 = vector.broadcast %10 : vector<1x128xf32> to vector<8x128xf32>
    %12 = arith.subf %6, %11 : vector<8x128xf32>
    %13 = arith.mulf %12, %12 : vector<8x128xf32>
    %cst_7 = arith.constant dense<0.000000e+00> : vector<128xf32>
    %14 = vector.multi_reduction <add>, %13, %cst_7 [0] : vector<8x128xf32> to vector<128xf32>
    %15 = vector.shape_cast %14 : vector<128xf32> to vector<1x128xf32>
    %cst_8 = arith.constant 8.000000e+00 : f32
    %16 = vector.broadcast %cst_8 : f32 to vector<1x128xf32>
    %17 = arith.divf %15, %16 : vector<1x128xf32>
    %cst_9 = arith.constant 9.99999974E-6 : f32
    %18 = vector.broadcast %cst_9 : f32 to vector<1x128xf32>
    %19 = arith.addf %17, %18 : vector<1x128xf32>
    %20 = math.rsqrt %19 : vector<1x128xf32>
    %21 = vector.broadcast %20 : vector<1x128xf32> to vector<8x128xf32>
    %22 = arith.mulf %12, %21 : vector<8x128xf32>
    %23 = vector.extract_strided_slice %3 {offsets = [1, 0], sizes = [1, 128], strides = [1, 1]} : vector<3x128xf32> to vector<1x128xf32>
    %24 = vector.broadcast %23 : vector<1x128xf32> to vector<8x128xf32>
    %25 = arith.mulf %22, %24 : vector<8x128xf32>
    %26 = vector.extract_strided_slice %3 {offsets = [2, 0], sizes = [1, 128], strides = [1, 1]} : vector<3x128xf32> to vector<1x128xf32>
    %27 = vector.broadcast %26 : vector<1x128xf32> to vector<8x128xf32>
    %28 = arith.addf %25, %27 : vector<8x128xf32>
    %cst_10 = arith.constant 0.000000e+00 : f32
    %29 = vector.broadcast %cst_10 : f32 to vector<8x128xf32>
    %30 = arith.maximumf %28, %29 : vector<8x128xf32>
    %31 = arith.truncf %30 : vector<8x128xf32> to vector<8x128xbf16>
    %c0_11 = arith.constant 0 : index
    %c0_12 = arith.constant 0 : index
    %32 = vector.load %arg3[%c0_11, %c0_12] : memref<128x128xbf16, #tpu.memory_space<vmem>>, vector<128x128xbf16>
    %cst_13 = arith.constant dense<0.000000e+00> : vector<8x128xf32>
    %33 = tpu.matmul %31, %32, %cst_13 {dimension_numbers = #tpu.dot_dimension_numbers<[1], [0], [0], [1], [0, 0, 1, 1], [], []>} : vector<8x128xbf16>, vector<128x128xbf16>, vector<8x128xf32> -> vector<8x128xf32>
    %c0_14 = arith.constant 0 : index
    %c0_15 = arith.constant 0 : index
    %34 = vector.load %arg6[%c0_14, %c0_15] : memref<3x128xf32, #tpu.memory_space<vmem>>, vector<3x128xf32>
    %35 = vector.extract_strided_slice %34 {offsets = [0, 0], sizes = [1, 128], strides = [1, 1]} : vector<3x128xf32> to vector<1x128xf32>
    %36 = vector.broadcast %35 : vector<1x128xf32> to vector<8x128xf32>
    %37 = arith.addf %33, %36 : vector<8x128xf32>
    %cst_16 = arith.constant dense<0.000000e+00> : vector<128xf32>
    %38 = vector.multi_reduction <add>, %37, %cst_16 [0] : vector<8x128xf32> to vector<128xf32>
    %39 = vector.shape_cast %38 : vector<128xf32> to vector<1x128xf32>
    %cst_17 = arith.constant 8.000000e+00 : f32
    %40 = vector.broadcast %cst_17 : f32 to vector<1x128xf32>
    %41 = arith.divf %39, %40 : vector<1x128xf32>
    %42 = vector.broadcast %41 : vector<1x128xf32> to vector<8x128xf32>
    %43 = arith.subf %37, %42 : vector<8x128xf32>
    %44 = arith.mulf %43, %43 : vector<8x128xf32>
    %cst_18 = arith.constant dense<0.000000e+00> : vector<128xf32>
    %45 = vector.multi_reduction <add>, %44, %cst_18 [0] : vector<8x128xf32> to vector<128xf32>
    %46 = vector.shape_cast %45 : vector<128xf32> to vector<1x128xf32>
    %cst_19 = arith.constant 8.000000e+00 : f32
    %47 = vector.broadcast %cst_19 : f32 to vector<1x128xf32>
    %48 = arith.divf %46, %47 : vector<1x128xf32>
    %cst_20 = arith.constant 9.99999974E-6 : f32
    %49 = vector.broadcast %cst_20 : f32 to vector<1x128xf32>
    %50 = arith.addf %48, %49 : vector<1x128xf32>
    %51 = math.rsqrt %50 : vector<1x128xf32>
    %52 = vector.broadcast %51 : vector<1x128xf32> to vector<8x128xf32>
    %53 = arith.mulf %43, %52 : vector<8x128xf32>
    %54 = vector.extract_strided_slice %34 {offsets = [1, 0], sizes = [1, 128], strides = [1, 1]} : vector<3x128xf32> to vector<1x128xf32>
    %55 = vector.broadcast %54 : vector<1x128xf32> to vector<8x128xf32>
    %56 = arith.mulf %53, %55 : vector<8x128xf32>
    %57 = vector.extract_strided_slice %34 {offsets = [2, 0], sizes = [1, 128], strides = [1, 1]} : vector<3x128xf32> to vector<1x128xf32>
    %58 = vector.broadcast %57 : vector<1x128xf32> to vector<8x128xf32>
    %59 = arith.addf %56, %58 : vector<8x128xf32>
    %cst_21 = arith.constant 0.000000e+00 : f32
    %60 = vector.broadcast %cst_21 : f32 to vector<8x128xf32>
    %61 = arith.maximumf %59, %60 : vector<8x128xf32>
    %62 = arith.truncf %61 : vector<8x128xf32> to vector<8x128xbf16>
    %c0_22 = arith.constant 0 : index
    %c0_23 = arith.constant 0 : index
    %63 = vector.load %arg4[%c0_22, %c0_23] : memref<128x128xbf16, #tpu.memory_space<vmem>>, vector<128x128xbf16>
    %cst_24 = arith.constant dense<0.000000e+00> : vector<8x128xf32>
    %64 = tpu.matmul %62, %63, %cst_24 {dimension_numbers = #tpu.dot_dimension_numbers<[1], [0], [0], [1], [0, 0, 1, 1], [], []>} : vector<8x128xbf16>, vector<128x128xbf16>, vector<8x128xf32> -> vector<8x128xf32>
    %c0_25 = arith.constant 0 : index
    %c0_26 = arith.constant 0 : index
    %65 = vector.load %arg7[%c0_25, %c0_26] : memref<3x128xf32, #tpu.memory_space<vmem>>, vector<3x128xf32>
    %66 = vector.extract_strided_slice %65 {offsets = [0, 0], sizes = [1, 128], strides = [1, 1]} : vector<3x128xf32> to vector<1x128xf32>
    %67 = vector.broadcast %66 : vector<1x128xf32> to vector<8x128xf32>
    %68 = arith.addf %64, %67 : vector<8x128xf32>
    %cst_27 = arith.constant dense<0.000000e+00> : vector<128xf32>
    %69 = vector.multi_reduction <add>, %68, %cst_27 [0] : vector<8x128xf32> to vector<128xf32>
    %70 = vector.shape_cast %69 : vector<128xf32> to vector<1x128xf32>
    %cst_28 = arith.constant 8.000000e+00 : f32
    %71 = vector.broadcast %cst_28 : f32 to vector<1x128xf32>
    %72 = arith.divf %70, %71 : vector<1x128xf32>
    %73 = vector.broadcast %72 : vector<1x128xf32> to vector<8x128xf32>
    %74 = arith.subf %68, %73 : vector<8x128xf32>
    %75 = arith.mulf %74, %74 : vector<8x128xf32>
    %cst_29 = arith.constant dense<0.000000e+00> : vector<128xf32>
    %76 = vector.multi_reduction <add>, %75, %cst_29 [0] : vector<8x128xf32> to vector<128xf32>
    %77 = vector.shape_cast %76 : vector<128xf32> to vector<1x128xf32>
    %cst_30 = arith.constant 8.000000e+00 : f32
    %78 = vector.broadcast %cst_30 : f32 to vector<1x128xf32>
    %79 = arith.divf %77, %78 : vector<1x128xf32>
    %cst_31 = arith.constant 9.99999974E-6 : f32
    %80 = vector.broadcast %cst_31 : f32 to vector<1x128xf32>
    %81 = arith.addf %79, %80 : vector<1x128xf32>
    %82 = math.rsqrt %81 : vector<1x128xf32>
    %83 = vector.broadcast %82 : vector<1x128xf32> to vector<8x128xf32>
    %84 = arith.mulf %74, %83 : vector<8x128xf32>
    %85 = vector.extract_strided_slice %65 {offsets = [1, 0], sizes = [1, 128], strides = [1, 1]} : vector<3x128xf32> to vector<1x128xf32>
    %86 = vector.broadcast %85 : vector<1x128xf32> to vector<8x128xf32>
    %87 = arith.mulf %84, %86 : vector<8x128xf32>
    %88 = vector.extract_strided_slice %65 {offsets = [2, 0], sizes = [1, 128], strides = [1, 1]} : vector<3x128xf32> to vector<1x128xf32>
    %89 = vector.broadcast %88 : vector<1x128xf32> to vector<8x128xf32>
    %90 = arith.addf %87, %89 : vector<8x128xf32>
    %c0_32 = arith.constant 0 : index
    %c0_33 = arith.constant 0 : index
    %91 = vector.load %arg8[%c0_32, %c0_33] : memref<8x128xf32, #tpu.memory_space<vmem>>, vector<8x128xf32>
    tpu.vector_store %arg8[%c0_32, %c0_33], %90 {strides = array<i32>} : memref<8x128xf32, #tpu.memory_space<vmem>>, vector<8x128xf32>,
    return
  }
  func.func @transform_0(%arg0: i32) -> (i32, i32) {
    %c0_i32 = arith.constant 0 : i32
    %c0_i32_0 = arith.constant 0 : i32
    %c0_i32_1 = arith.constant 0 : i32
    return %c0_i32, %c0_i32_0 : i32, i32
  }
  func.func @transform_1(%arg0: i32) -> (i32, i32) {
    %c0_i32 = arith.constant 0 : i32
    %c0_i32_0 = arith.constant 0 : i32
    %c0_i32_1 = arith.constant 0 : i32
    return %c0_i32, %c0_i32_0 : i32, i32
  }
  func.func @transform_2(%arg0: i32) -> (i32, i32) {
    %c0_i32 = arith.constant 0 : i32
    %c0_i32_0 = arith.constant 0 : i32
    %c0_i32_1 = arith.constant 0 : i32
    return %c0_i32, %c0_i32_0 : i32, i32
  }
  func.func @transform_3(%arg0: i32) -> (i32, i32) {
    %c0_i32 = arith.constant 0 : i32
    %c0_i32_0 = arith.constant 0 : i32
    %c0_i32_1 = arith.constant 0 : i32
    return %c0_i32, %c0_i32_0 : i32, i32
  }
  func.func @transform_4(%arg0: i32) -> (i32, i32) {
    %c0_i32 = arith.constant 0 : i32
    %c0_i32_0 = arith.constant 0 : i32
    %c0_i32_1 = arith.constant 0 : i32
    return %c0_i32, %c0_i32_0 : i32, i32
  }
  func.func @transform_5(%arg0: i32) -> (i32, i32) {
    %c0_i32 = arith.constant 0 : i32
    %c0_i32_0 = arith.constant 0 : i32
    %c0_i32_1 = arith.constant 0 : i32
    return %c0_i32, %c0_i32_0 : i32, i32
  }
  func.func @transform_6(%arg0: i32) -> (i32, i32) {
    %c0_i32 = arith.constant 0 : i32
    %c0_i32_0 = arith.constant 0 : i32
    %c0_i32_1 = arith.constant 0 : i32
    return %c0_i32, %c0_i32_0 : i32, i32
  }
  func.func @transform_7(%arg0: i32) -> (i32, i32) {
    %c0_i32 = arith.constant 0 : i32
    %c0_i32_0 = arith.constant 0 : i32
    %c0_i32_1 = arith.constant 0 : i32
    return %c0_i32, %c0_i32_0 : i32, i32
  }
}

</mosaic_0001>

<bundles_post_ra>
// kernel: tpu_custom_call.1
= control target key start
LH: loop header
LB: loop body
LE: loop exit
PB: predicated region body
PF: predicated region fallthrough
CT: control target
= control target key end

     0   :  { %12 = vsyncpa [#allocation3], 0  ;;  %s937_s0 = inlined_call_operand.hbm [shape: bf16[8,128], index: 0, kind: input, shape index: {}]   ;;  %s938_s1 = inlined_call_operand.hbm [shape: bf16[128,128], index: 1, kind: input, shape index: {}]   ;;  %s939_s2 = inlined_call_operand.hbm [shape: bf16[128,128], index: 2, kind: input, shape index: {}]   ;;  %s940_s3 = inlined_call_operand.hbm [shape: bf16[128,128], index: 3, kind: input, shape index: {}]   ;;  %s941_s4 = inlined_call_operand.vmem [shape: f32[3,128], index: 4, kind: input, shape index: {}]   ;;  %s942_s5 = inlined_call_operand.vmem [shape: f32[3,128], index: 5, kind: input, shape index: {}]   ;;  %s943_s6 = inlined_call_operand.hbm [shape: f32[3,128], index: 6, kind: input, shape index: {}]   ;;  %s944_s7 = inlined_call_operand.hbm [shape: f32[8,128], index: 7, kind: output, shape index: {}]  }
   0x1   :  { %13 = vsyncpa [#allocation6], 0 }
   0x2   :  { %14 = vsyncpa [#allocation9], 0 }
   0x3   :  { %15 = vsyncpa [#allocation4], 0  ;;  %s809_s24 = smov [#allocation5]  }
   0x4   :  { %s31_s25 = sshll.u32 %s809_s24, 4  ;;  %s32_s25 = int_to_ptr.vmem [resolvable:$true] %s31_s25 }
   0x5   :  { %s689_s26 = scalar_lea.vmem %s32_s25, 1024  ;;  %p694_p1 = scmp.lt.s32.totalorder %s32_s25, %s32_s25 }
   0x6   :  { %p690_p0 = scmp.ne.s32.totalorder %s32_s25, %s689_s26  ;;  %p695_p2 = scmp.lt.s32.totalorder %s689_s26, %s689_s26 }
   0x8   :  { %p696_p3 = por %p695_p2, %p694_p1 }
   0xa   :  { %p697_p4 = pnand %p696_p3, %p690_p0 }
   0xc   :  { %700 = shalt.err (!%p697_p4)
}
   0xd   :  { %s810_s27 = smov 64   ;;  %s811_s28 = smov 4  }
   0xe   :  { %37 = dma.hbm_to_vmem [thread:$0]  %s938_s1, 1024, %s32_s25, [#allocation6], %s810_s27, %s810_s27, %s811_s28  }
   0xf   :  { %s812_s8 = smov [#allocation8]   ;;  %s813_s10 = smov [#allocation2]  }
  0x10   :  { %s55_s9 = sshll.u32 %s812_s8, 4  ;;  %s22_s11 = sshll.u32 %s813_s10, 4  ;;  %s56_s9 = int_to_ptr.vmem [resolvable:$true] %s55_s9  ;;  %s23_s11 = int_to_ptr.vmem [resolvable:$true] %s22_s11 }
  0x11   :  { %s709_s12 = scalar_lea.vmem %s56_s9, 1024  ;;  %p714_p6 = scmp.lt.s32.totalorder %s56_s9, %s56_s9 }
  0x12   :  { %p710_p5 = scmp.ne.s32.totalorder %s56_s9, %s709_s12  ;;  %p715_p7 = scmp.lt.s32.totalorder %s709_s12, %s709_s12 }
  0x14   :  { %p716_p8 = por %p715_p7, %p714_p6 }
  0x16   :  { %p717_p9 = pnand %p716_p8, %p710_p5 }
  0x18   :  { %720 = shalt.err (!%p717_p9)
}
  0x19   :  { %61 = dma.hbm_to_vmem [thread:$0]  %s940_s3, 1024, %s56_s9, [#allocation9], %s810_s27, %s810_s27, %s811_s28  }
  0x1a   :  { %s729_s1 = scalar_lea.vmem %s23_s11, 64  ;;  %p734_p11 = scmp.lt.s32.totalorder %s23_s11, %s23_s11 }
  0x1b   :  { %p730_p10 = scmp.ne.s32.totalorder %s23_s11, %s729_s1  ;;  %p735_p12 = scmp.lt.s32.totalorder %s729_s1, %s729_s1 }
  0x1d   :  { %p736_p13 = por %p735_p12, %p734_p11 }
  0x1f   :  { %p737_p0 = pnand %p736_p13, %p730_p10 }
  0x21   :  { %740 = shalt.err (!%p737_p0)
}
  0x22   :  { %25 = dma.hbm_to_vmem [thread:$0]  %s937_s0, 64, %s23_s11, [#allocation3]  }
  0x23   :  { %s814_s17 = smov [#allocation7]   ;;  %s815_s19 = smov [#allocation10]  }
  0x24   :  { %s43_s18 = sshll.u32 %s814_s17, 4  ;;  %s72_s20 = sshll.u32 %s815_s19, 4  ;;  %s44_s18 = int_to_ptr.vmem [resolvable:$true] %s43_s18  ;;  %s73_s20 = int_to_ptr.vmem [resolvable:$true] %s72_s20 }
  0x25   :  { %s749_s21 = scalar_lea.vmem %s44_s18, 1024  ;;  %p754_p2 = scmp.lt.s32.totalorder %s44_s18, %s44_s18 }
  0x26   :  { %p750_p1 = scmp.ne.s32.totalorder %s44_s18, %s749_s21  ;;  %p755_p3 = scmp.lt.s32.totalorder %s749_s21, %s749_s21 }
  0x28   :  { %p756_p4 = por %p755_p3, %p754_p2 }
  0x2a   :  { %p757_p5 = pnand %p756_p4, %p750_p1 }
  0x2c   :  { %760 = shalt.err (!%p757_p5)
}
  0x2d   :  { %49 = dma.hbm_to_vmem [thread:$0]  %s939_s2, 1024, %s44_s18, [#allocation6], %s810_s27, %s810_s27, %s811_s28  }
  0x2e   :  { %s769_s0 = scalar_lea.vmem %s73_s20, 64  ;;  %p774_p7 = scmp.lt.s32.totalorder %s73_s20, %s73_s20 }
  0x2f   :  { %p770_p6 = scmp.ne.s32.totalorder %s73_s20, %s769_s0  ;;  %p775_p8 = scmp.lt.s32.totalorder %s769_s0, %s769_s0 }
  0x31   :  { %p776_p9 = por %p775_p8, %p774_p7 }
  0x33   :  { %p777_p10 = pnand %p776_p9, %p770_p6 }
  0x35   :  { %780 = shalt.err (!%p777_p10)
}
  0x36   :  { %75 = dma.hbm_to_vmem [thread:$0]  %s943_s6, 64, %s73_s20, [#allocation9]  }
  0x37   :  { %801 = dma.done.wait [#allocation3], 64  }
  0x38   :  { %802 = vsyncadd [#allocation3], 4294967232 }
  0x39   :  { %803 = dma.done.wait [#allocation6], 2048  }
  0x3a   :  { %804 = vsyncadd [#allocation6], 4294965248 }
  0x3b   :  { %805 = dma.done.wait [#allocation9], 1088  }
  0x3c   :  { %806 = vsyncadd [#allocation9], 4294966208  ;;  %v816_v0 = vmov 0.0   ;;  %vm817_vm0 = vmmov 0   ;;  %v651_v1 = vld [vmem:[#allocation5 + $0x38] sm:$0xff]   ;;  %v652_v2 = vld [vmem:[#allocation5 + $0x30] sm:$0xff]   ;;  %v110_v18 = vlaneseq }
  0x3d   :  { %581 = vmatprep.subr.bf16.mxu0 %v816_v0  ;;  %597 = vmatprep.mubr.msk.bf16.mxu0 %vm817_vm0, %v816_v0  ;;  %v653_v3 = vld [vmem:[#allocation5 + $0x28] sm:$0xff]   ;;  %v654_v4 = vld [vmem:[#allocation5 + $0x20] sm:$0xff]   ;;  %v655_v5 = vld [vmem:[#allocation5 + $0x18] sm:$0xff]  }
  0x3e   :  { %601 = vmatprep.subr.bf16.mxu1 %v816_v0  ;;  %617 = vmatprep.mubr.msk.bf16.mxu1 %vm817_vm0, %v816_v0  ;;  %v656_v6 = vld [vmem:[#allocation5 + $0x10] sm:$0xff]   ;;  %v657_v7 = vld [vmem:[#allocation5 + $0x8] sm:$0xff]   ;;  %v658_v8 = vld [vmem:[#allocation5] sm:$0xff]   ;;  %v111_v19 = vshrl.u32 %v110_v18, 7 }
  0x3f   :  { %582 = vmatpush3.bf16.msra.mxu0 %v651_v1  ;;  %v92_v9 = vld [vmem:[#allocation2] sm:$0xf]  ;;  %v660_v11 = vld [vmem:[#allocation7 + $0x30] sm:$0xff]   ;;  %v661_v12 = vld [vmem:[#allocation7 + $0x28] sm:$0xff]  }
  0x40   :  { %583 = vmatprep.subr.bf16.mxu0 %v816_v0  ;;  %v659_v10 = vld [vmem:[#allocation7 + $0x38] sm:$0xff]   ;;  %v662_v13 = vld [vmem:[#allocation7 + $0x20] sm:$0xff]   ;;  %v664_v15 = vld [vmem:[#allocation7 + $0x10] sm:$0xff]   ;;  %v906_v20 = vsub.s32 0, %v111_v19  ;;  %v912_v45 = vsub.s32 1, %v111_v19  ;;  %v914_v46 = vsub.s32 2, %v111_v19 }
  0x41   :  { %602 = vmatpush3.bf16.msra.mxu1 %v659_v10  ;;  %v663_v14 = vld [vmem:[#allocation7 + $0x18] sm:$0xff]   ;;  %v665_v16 = vld [vmem:[#allocation7 + $0x8] sm:$0xff]   ;;  %v666_v17 = vld [vmem:[#allocation7] sm:$0xff]  }
  0x42   :  { %603 = vmatprep.subr.bf16.mxu1 %v816_v0  ;;  %v109_v21 = vld [vmem:[%s941_s4] sm:$0x7]  ;;  %v668_v56 = vld [vmem:[#allocation8 + $0x30] sm:$0xff]   ;;  %v669_v57 = vld [vmem:[#allocation8 + $0x28] sm:$0xff]  }
  0x43   :  { %584 = vmatpush3.bf16.msra.mxu0 %v652_v2  ;;  %v113_v22 = vrot.slane %v109_v21, %v906_v20  ;;  %v225_v47 = vrot.slane %v109_v21, %v912_v45  ;;  %v230_v50 = vrot.slane %v109_v21, %v914_v46  ;;  %v667_v55 = vld [vmem:[#allocation8 + $0x38] sm:$0xff]   ;;  %v670_v58 = vld [vmem:[#allocation8 + $0x20] sm:$0xff]   ;;  %v672_v60 = vld [vmem:[#allocation8 + $0x10] sm:$0xff]  }
  0x44   :  { %585 = vmatprep.subr.bf16.mxu0 %v816_v0  ;;  %v671_v59 = vld [vmem:[#allocation8 + $0x18] sm:$0xff]   ;;  %v673_v61 = vld [vmem:[#allocation8 + $0x8] sm:$0xff]   ;;  %v674_v62 = vld [vmem:[#allocation8] sm:$0xff]  }
  0x45   :  { %604 = vmatpush3.bf16.msra.mxu1 %v660_v11  ;;  %v250_v63 = vld [vmem:[%s942_s5] sm:$0x7]  ;;  %s818_s5 = smov [#allocation11]  }
  0x46   :  { %605 = vmatprep.subr.bf16.mxu1 %v816_v0  ;;  %v254_v1 = vrot.slane %v250_v63, %v906_v20  ;;  %s519_s26 = sshll.u32 %s818_s5, 4  ;;  %s520_s26 = int_to_ptr.vmem [resolvable:$true] %s519_s26 }
  0x47   :  { %586 = vmatpush3.bf16.msra.mxu0 %v653_v3  ;;  %s781_s27 = scalar_lea.vmem %s520_s26, 128  ;;  %p786_p12 = scmp.lt.s32.totalorder %s520_s26, %s520_s26 }
  0x48   :  { %587 = vmatprep.subr.bf16.mxu0 %v816_v0  ;;  %p782_p11 = scmp.ne.s32.totalorder %s520_s26, %s781_s27  ;;  %p787_p13 = scmp.lt.s32.totalorder %s781_s27, %s781_s27 }
  0x49   :  { %606 = vmatpush3.bf16.msra.mxu1 %v661_v12 }
  0x4a   :  { %607 = vmatprep.subr.bf16.mxu1 %v816_v0  ;;  %p788_p0 = por %p787_p13, %p786_p12 }
  0x4b   :  { %588 = vmatpush3.bf16.msra.mxu0 %v654_v4 }
  0x4c   :  { %589 = vmatprep.subr.bf16.mxu0 %v816_v0  ;;  %p789_p1 = pnand %p788_p0, %p782_p11 }
  0x4d   :  { %608 = vmatpush3.bf16.msra.mxu1 %v662_v13 }
  0x4e   :  { %609 = vmatprep.subr.bf16.mxu1 %v816_v0 }
  0x4f   :  { %590 = vmatpush3.bf16.msra.mxu0 %v655_v5 }
  0x50   :  { %591 = vmatprep.subr.bf16.mxu0 %v816_v0 }
  0x51   :  { %610 = vmatpush3.bf16.msra.mxu1 %v663_v14 }
  0x52   :  { %611 = vmatprep.subr.bf16.mxu1 %v816_v0 }
  0x53   :  { %592 = vmatpush3.bf16.msra.mxu0 %v656_v6 }
  0x54   :  { %593 = vmatprep.subr.bf16.mxu0 %v816_v0 }
  0x55   :  { %612 = vmatpush3.bf16.msra.mxu1 %v664_v15 }
  0x56   :  { %613 = vmatprep.subr.bf16.mxu1 %v816_v0 }
  0x57   :  { %594 = vmatpush3.bf16.msra.mxu0 %v657_v7 }
  0x58   :  { %595 = vmatprep.subr.bf16.mxu0 %v816_v0 }
  0x59   :  { %614 = vmatpush3.bf16.msra.mxu1 %v665_v16 }
  0x5a   :  { %615 = vmatprep.subr.bf16.mxu1 %v816_v0 }
  0x5b   :  { %596 = vmatpush3.bf16.msra.mxu0 %v658_v8 }
  0x5c   :  { %621 = vmatprep.subr.bf16.mxu0 %v816_v0 }
  0x5d   :  { %616 = vmatpush3.bf16.msra.mxu1 %v666_v17 }
  0x5e   :  { %598 = vmatmul.mubr.bf16.vlgmr.msra.gmra.mxu0 %v92_v9 }
  0x5f   :  { %637 = vmatprep.mubr.msk.bf16.mxu0 %vm817_vm0, %v816_v0  ;;  %622 = vmatpush3.bf16.msra.mxu0 %v667_v55 }
  0x60   :  { %623 = vmatprep.subr.bf16.mxu0 %v816_v0 }
  0x63   :  { %624 = vmatpush3.bf16.msra.mxu0 %v668_v56 }
  0x64   :  { %625 = vmatprep.subr.bf16.mxu0 %v816_v0 }
  0x67   :  { %626 = vmatpush3.bf16.msra.mxu0 %v669_v57 }
  0x68   :  { %627 = vmatprep.subr.bf16.mxu0 %v816_v0 }
  0x6b   :  { %628 = vmatpush3.bf16.msra.mxu0 %v670_v58 }
  0x6c   :  { %629 = vmatprep.subr.bf16.mxu0 %v816_v0 }
  0x6f   :  { %630 = vmatpush3.bf16.msra.mxu0 %v671_v59 }
  0x70   :  { %631 = vmatprep.subr.bf16.mxu0 %v816_v0 }
  0x73   :  { %632 = vmatpush3.bf16.msra.mxu0 %v672_v60 }
  0x74   :  { %633 = vmatprep.subr.bf16.mxu0 %v816_v0 }
  0x77   :  { %634 = vmatpush3.bf16.msra.mxu0 %v673_v61 }
  0x78   :  { %635 = vmatprep.subr.bf16.mxu0 %v816_v0 }
  0x7b   :  { %636 = vmatpush3.bf16.msra.mxu0 %v674_v62 }
 0x11e   :  { %v196_v23 = vpop.f32.mrf.mxu0 }
 0x11f   :  { %v197_v24 = vadd.f32 %v196_v23, %v113_v22 }
 0x120   :  { %v599_v25 = vpop.f32.mrf.mxu0 }
 0x121   :  { %v202_v26 = vrot.slane %v197_v24, 4 }
 0x122   :  { %v199_v27 = vpop.f32.mrf.mxu0 }
 0x123   :  { %v203_v28 = vadd.f32 %v202_v26, %v197_v24  ;;  %v370_v27 = vrot.slane %v250_v63, %v914_v46 }
 0x124   :  { %v600_v29 = vpop.f32.mrf.mxu0 }
 0x125   :  { %v204_v30 = vrot.slane %v203_v28, 2 }
 0x127   :  { %v205_v31 = vadd.f32 %v204_v30, %v203_v28 }
 0x129   :  { %v206_v32 = vrot.slane %v205_v31, 1 }
 0x12b   :  { %v207_v33 = vadd.f32 %v206_v32, %v205_v31  ;;  %v390_v32 = vld [vmem:[#allocation10] sm:$0x7] }
 0x12c   :  { %v505_v57 = vrot.slane %v390_v32, %v912_v45  ;;  %v510_v60 = vrot.slane %v390_v32, %v914_v46 }
 0x12d   :  { %v209_v34 = vmul.f32 0.125, %v207_v33  ;;  %v394_v33 = vrot.slane %v390_v32, %v906_v20 }
 0x12f   :  { %v210_v35 = vsub.f32 %v197_v24, %v209_v34  ;;  %v365_v24 = vrot.slane %v250_v63, %v912_v45 }
 0x131   :  { %v211_v36 = vmul.f32 %v210_v35, %v210_v35 }
 0x133   :  { %v212_v37 = vrot.slane %v211_v36, 4 }
 0x135   :  { %v213_v38 = vadd.f32 %v212_v37, %v211_v36 }
 0x137   :  { %v214_v39 = vrot.slane %v213_v38, 2 }
 0x139   :  { %v215_v40 = vadd.f32 %v214_v39, %v213_v38 }
 0x13b   :  { %v216_v41 = vrot.slane %v215_v40, 1 }
 0x13d   :  { %v217_v42 = vadd.f32 %v216_v41, %v215_v40 }
 0x13f   :  { %v218_v43 = vmul.f32 0.125, %v217_v42 }
 0x141   :  { %v219_v44 = vadd.f32 1e-05, %v218_v43 }
 0x143   :  { %675 = vrsqrt.f32 %v219_v44 }
 0x150   :  { %v676_v48 = vpop.eup %675 }
 0x151   :  { %v221_v49 = vmul.f32 %v676_v48, %v210_v35 }
 0x153   :  { %v226_v51 = vmul.f32 %v225_v47, %v221_v49 }
 0x155   :  { %v231_v52 = vadd.f32 %v230_v50, %v226_v51 }
 0x157   :  { %v232_v53 = vmax.f32 %v231_v52, 0.0 }
 0x159   :  { %v233_v54 = vpack.c.bf16 %v232_v53, %v232_v53 }
 0x15b   :  { %618 = vmatmul.mubr.bf16.vlgmr.msra.gmra.mxu1 %v233_v54 }
 0x21b   :  { %v337_v2 = vpop.f32.mrf.mxu1 }
 0x21c   :  { %v338_v3 = vadd.f32 %v337_v2, %v254_v1 }
 0x21d   :  { %v619_v4 = vpop.f32.mrf.mxu1 }
 0x21e   :  { %v343_v5 = vrot.slane %v338_v3, 4 }
 0x21f   :  { %v340_v6 = vpop.f32.mrf.mxu1 }
 0x220   :  { %v344_v7 = vadd.f32 %v343_v5, %v338_v3 }
 0x221   :  { %v620_v8 = vpop.f32.mrf.mxu1 }
 0x222   :  { %v345_v9 = vrot.slane %v344_v7, 2 }
 0x224   :  { %v346_v10 = vadd.f32 %v345_v9, %v344_v7 }
 0x226   :  { %v347_v11 = vrot.slane %v346_v10, 1 }
 0x228   :  { %v348_v12 = vadd.f32 %v347_v11, %v346_v10 }
 0x22a   :  { %v349_v13 = vmul.f32 0.125, %v348_v12 }
 0x22c   :  { %v350_v0 = vsub.f32 %v338_v3, %v349_v13 }
 0x22e   :  { %v351_v14 = vmul.f32 %v350_v0, %v350_v0 }
 0x230   :  { %v352_v15 = vrot.slane %v351_v14, 4 }
 0x232   :  { %v353_v16 = vadd.f32 %v352_v15, %v351_v14 }
 0x234   :  { %v354_v17 = vrot.slane %v353_v16, 2 }
 0x236   :  { %v355_v18 = vadd.f32 %v354_v17, %v353_v16 }
 0x238   :  { %v356_v19 = vrot.slane %v355_v18, 1 }
 0x23a   :  { %v357_v21 = vadd.f32 %v356_v19, %v355_v18 }
 0x23c   :  { %v358_v22 = vmul.f32 0.125, %v357_v21 }
 0x23e   :  { %v359_v23 = vadd.f32 1e-05, %v358_v22 }
 0x240   :  { %677 = vrsqrt.f32 %v359_v23 }
 0x24d   :  { %v678_v25 = vpop.eup %677 }
 0x24e   :  { %v361_v26 = vmul.f32 %v678_v25, %v350_v0 }
 0x250   :  { %v366_v28 = vmul.f32 %v365_v24, %v361_v26 }
 0x252   :  { %v371_v29 = vadd.f32 %v370_v27, %v366_v28 }
 0x254   :  { %v372_v30 = vmax.f32 %v371_v29, 0.0 }
 0x256   :  { %v373_v31 = vpack.c.bf16 %v372_v30, %v372_v30 }
 0x258   :  { %638 = vmatmul.mubr.bf16.vlgmr.msra.gmra.mxu0 %v373_v31 }
 0x318   :  { %v477_v34 = vpop.f32.mrf.mxu0 }
 0x319   :  { %v478_v35 = vadd.f32 %v477_v34, %v394_v33 }
 0x31a   :  { %v639_v36 = vpop.f32.mrf.mxu0 }
 0x31b   :  { %v483_v37 = vrot.slane %v478_v35, 4 }
 0x31c   :  { %v480_v38 = vpop.f32.mrf.mxu0 }
 0x31d   :  { %v484_v39 = vadd.f32 %v483_v37, %v478_v35 }
 0x31e   :  { %v640_v40 = vpop.f32.mrf.mxu0 }
 0x31f   :  { %v485_v41 = vrot.slane %v484_v39, 2 }
 0x321   :  { %v486_v42 = vadd.f32 %v485_v41, %v484_v39 }
 0x323   :  { %v487_v43 = vrot.slane %v486_v42, 1 }
 0x325   :  { %v488_v44 = vadd.f32 %v487_v43, %v486_v42 }
 0x327   :  { %v489_v47 = vmul.f32 0.125, %v488_v44 }
 0x329   :  { %v490_v48 = vsub.f32 %v478_v35, %v489_v47 }
 0x32b   :  { %v491_v49 = vmul.f32 %v490_v48, %v490_v48 }
 0x32d   :  { %v492_v50 = vrot.slane %v491_v49, 4 }
 0x32f   :  { %v493_v51 = vadd.f32 %v492_v50, %v491_v49 }
 0x331   :  { %v494_v52 = vrot.slane %v493_v51, 2 }
 0x333   :  { %v495_v53 = vadd.f32 %v494_v52, %v493_v51 }
 0x335   :  { %v496_v54 = vrot.slane %v495_v53, 1 }
 0x337   :  { %v497_v20 = vadd.f32 %v496_v54, %v495_v53 }
 0x339   :  { %v498_v55 = vmul.f32 0.125, %v497_v20 }
 0x33b   :  { %v499_v56 = vadd.f32 1e-05, %v498_v55 }
 0x33d   :  { %679 = vrsqrt.f32 %v499_v56 }
 0x34a   :  { %v680_v58 = vpop.eup %679 }
 0x34b   :  { %v501_v59 = vmul.f32 %v680_v58, %v490_v48 }
 0x34d   :  { %v506_v61 = vmul.f32 %v505_v57, %v501_v59 }
 0x34f   :  { %v511_v62 = vadd.f32 %v510_v60, %v506_v61 }
 0x351   :  { %512 = vst [vmem:[#allocation11] sm:$0xff] %v511_v62 }
 0x352   :  { %792 = shalt.err (!%p789_p1)
}
 0x353   :  { %522 = dma.vmem_to_hbm [thread:$0]  %s520_s26, 128, %s944_s7, [#allocation4]  }
 0x354   :  { %807 = dma.done.wait [#allocation4], 128  }
 0x355   :  { %808 = vsyncadd [#allocation4], 4294967168 }
 0x356   :  { %526 = vsyncpa [#allocation3], 1 }
 0x357   :  { %527 = vsyncpa [#allocation6], 1 }
 0x358   :  { %528 = vsyncpa [#allocation9], 1 }
 0x359   :  { %529 = vsyncpa [#allocation4], 1 }

</bundles_post_ra>
